<compile_context>
chip_gen: v6e
topology: v6e:2x2x1
jax: 0.10.0
libtpu: 0.0.40
codegen_flags: <defaults>
</compile_context>

<pallas_src>
from functools import partial

import jax
import jax.numpy as jnp
from jax.experimental import pallas as pl
from jax.experimental.pallas import tpu as pltpu


# ----------------------------- Pallas kernel --------------------------------
def _transreid_add_kernel(x_ref, pos_ref, cam_ref, o_ref):
    # x_ref:   (TB, TN, D)  tokens
    # pos_ref: (1,  TN, D)  positional-embedding slice
    # cam_ref: (TB, 1,  D)  pre-gathered, cam_lambda-scaled camera rows (f32)
    # out[b, n, d] = x[b, n, d] + pos[0, n, d] + cam[b, 0, d]
    acc = (x_ref[...].astype(jnp.float32)
           + pos_ref[...].astype(jnp.float32)
           + cam_ref[...].astype(jnp.float32))
    o_ref[...] = acc.astype(o_ref.dtype)


# ----------------------------- tiling helpers --------------------------------
def _vmem_capacity_bytes():
    try:
        return int(pltpu.get_tpu_info().vmem_capacity_bytes)
    except Exception:
        return 64 << 20  # conservative default (v7x per-TC VMEM)


def _pick_tiles(B, N, D, itemsize, target_bytes):
    """Pick (TB, TN) so a block is ~target_bytes; TN multiple of 8 unless == N."""
    per_sample = max(N * D * itemsize, 1)
    if per_sample <= target_bytes:
        TB = max(1, min(B, target_bytes // per_sample))
        TN = N
    else:
        TB = 1
        rows = max(8, target_bytes // max(D * itemsize, 1))
        TN = min(N, (rows // 8) * 8)        # sublane-aligned unless full dim
    # Keep >= 2 batch grid steps so the second TensorCore on v7x gets work.
    if B >= 2:
        TB = min(TB, max(1, B // 2))
    return TB, TN


# ------------------------------- forward ------------------------------------
@partial(jax.jit, static_argnames=("cam_lambda", "embed_dim"))
def transreid_forward(x, cam_label, params, *, cam_lambda: float, embed_dim: int):
    """Forward pass of TransReID (== forward_features).

    x: (B, C, H, W) NCHW input, or already-tokenized (B, N, D) which is
       returned unchanged (PyTorch: `if x.dim() == 3: return x`).
    cam_label: (B,) int camera ids (clamped to valid range like the reference).
    """
    if x.ndim == 3:
        return x

    B, C, H, W = x.shape
    # TODO(synk): PyTorch hard-codes x.view(B, -1, 768); we use embed_dim so a
    # small test config stays consistent (identical math when embed_dim == 768).
    assert (C * H * W) % embed_dim == 0
    D = embed_dim
    N = (C * H * W) // D
    x_tok = x.reshape(B, N, D)

    pos_embed = params["pos_embed"]                       # (1, num_patches+1, D)
    Cam = params["Cam"]                                   # (camera, 1, D)
    assert N <= pos_embed.shape[1], "more tokens than positional embeddings"
    pos_slab = pos_embed[:, :N, :]                        # (1, N, D)

    # torch.clamp(camera_id, 0, Cam.shape[0]-1) -> gather -> pre-fold cam_lambda
    # (kept in f32; the cast to out dtype happens after the in-kernel add).
    cam_id = jnp.clip(cam_label, 0, Cam.shape[0] - 1).astype(jnp.int32)
    cam_emb = jnp.float32(cam_lambda) * Cam[cam_id].astype(jnp.float32)   # (B,1,D)

    itemsize = jnp.dtype(x_tok.dtype).itemsize
    vmem_cap = _vmem_capacity_bytes()
    # ~4 MiB blocks on 64 MiB parts (v7x), ~8 MiB on 128 MiB parts (v5e/v6e).
    target_bytes = max(2 << 20, min(8 << 20, vmem_cap // 16))
    TB, TN = _pick_tiles(B, N, D, itemsize, target_bytes)
    nb = pl.cdiv(B, TB)
    nn = pl.cdiv(N, TN)

    # VMEM accounting: x + out double-buffered, pos single-buffered when
    # resident (nn == 1), cam double-buffered, plus headroom.  Ceiling at 3/4
    # of physical VMEM leaves compiler-internal scratch headroom (v7x).
    blk_bytes = TB * TN * D * itemsize
    pos_bytes = TN * D * jnp.dtype(pos_slab.dtype).itemsize
    cam_bytes = TB * D * 4
    pos_single = (nn == 1)
    vmem_needed = (4 * blk_bytes
                   + (1 if pos_single else 2) * pos_bytes
                   + 2 * cam_bytes
                   + (2 << 20))
    vmem_limit = int(min(max(vmem_needed, 32 << 20), (vmem_cap * 3) // 4))

    # pos embedding never changes its block index when N is untiled -> single
    # buffer it (frees VMEM for bigger token blocks).
    pos_spec = None
    if pos_single and hasattr(pl, "Buffered"):
        try:
            pos_spec = pl.BlockSpec((1, TN, D), lambda b, n: (0, n, 0),
                                    pipeline_mode=pl.Buffered(1))
        except TypeError:
            pos_spec = None
    if pos_spec is None:
        pos_spec = pl.BlockSpec((1, TN, D), lambda b, n: (0, n, 0))

    cost = pl.CostEstimate(
        flops=2 * B * N * D,
        transcendentals=0,
        bytes_accessed=(2 * B * N * D * itemsize          # x read + out write
                        + N * D * itemsize                 # pos read
                        + B * D * 4),                      # cam read
    )

    out = pl.pallas_call(
        _transreid_add_kernel,
        out_shape=jax.ShapeDtypeStruct((B, N, D), x_tok.dtype),
        grid=(nb, nn),
        in_specs=[
            pl.BlockSpec((TB, TN, D), lambda b, n: (b, n, 0)),   # x tokens
            pos_spec,                                            # pos embedding
            pl.BlockSpec((TB, 1, D), lambda b, n: (b, 0, 0)),    # cam rows
        ],
        out_specs=pl.BlockSpec((TB, TN, D), lambda b, n: (b, n, 0)),
        compiler_params=pltpu.CompilerParams(
            dimension_semantics=("parallel", "parallel"),
            vmem_limit_bytes=vmem_limit,
        ),
        cost_estimate=cost,
    )(x_tok, pos_slab, cam_emb)

    return out


# ------------------------- deterministic parameters --------------------------
def init_params(key, *, embed_dim, num_patches, camera, std=0.02):
    k_pos, k_cls, k_cam = jax.random.split(key, 3)

    def trunc_normal(k, shape):
        # TODO(synk): PyTorch trunc_normal_ truncates at absolute +/-2 (~100
        # sigma for std=0.02); +/-2 sigma truncation is statistically
        # equivalent and init-only, not a forward-correctness issue.
        return (std * jax.random.truncated_normal(k, -2.0, 2.0, shape)).astype(
            jnp.float32
        )

    # TODO(synk): Block/Attention/Mlp/patch_embed/fc weights exist in __init__
    # but are unreachable from forward(), so they are not materialized here.
    return {
        "pos_embed": trunc_normal(k_pos, (1, num_patches + 1, embed_dim)),
        "cls_token": trunc_normal(k_cls, (1, 1, embed_dim)),  # unused in forward
        "Cam": trunc_normal(k_cam, (camera, 1, embed_dim)),
    }


# ------------------------------------ main -----------------------------------
if __name__ == "__main__":
    # Small synthetic config consistent with the forward path.
    B, C, H, W = 2, 4, 16, 16            # NCHW input
    embed_dim = 128                      # lane-aligned token width
    img_size, patch_size, stride_size = 16, 4, 4
    num_x = (img_size - patch_size) // stride_size + 1
    num_y = (img_size - patch_size) // stride_size + 1
    num_patches = num_x * num_y          # 16 -> pos_embed length 17
    camera = 4
    cam_lambda = 3.0

    key = jax.random.PRNGKey(0)
    k_x, k_cam, k_p = jax.random.split(key, 3)

    x = jax.random.normal(k_x, (B, C, H, W), dtype=jnp.float32)
    cam_label = jax.random.randint(k_cam, (B,), -1, camera + 1)  # exercise clamp

    params = init_params(
        k_p, embed_dim=embed_dim, num_patches=num_patches, camera=camera
    )

    out = transreid_forward(
        x, cam_label, params, cam_lambda=cam_lambda, embed_dim=embed_dim
    )
    out = jax.block_until_ready(out)

    # Pure-JAX reference of the same semantics.
    N = (C * H * W) // embed_dim
    x_tok_ref = x.reshape(B, N, embed_dim)
    cam_id = jnp.clip(cam_label, 0, camera - 1)
    cam_emb_ref = params["Cam"][cam_id][:, 0, :]               # (B, D)
    ref = (
        x_tok_ref
        + params["pos_embed"][:, :N, :]
        + cam_lambda * cam_emb_ref[:, None, :]
    )
    assert out.shape == (B, N, embed_dim)
    assert jnp.allclose(out, ref, atol=1e-5, rtol=1e-5)

    print("KERNEL_OK")
</pallas_src>

<mosaic_0001>
module attributes {stable_mosaic.version = 11 : i64} {
  func.func @_transreid_add_kernel(%arg0: i32, %arg1: i32, %arg2: memref<1x8x128xf32, #tpu.memory_space<vmem>>, %arg3: memref<1x8x128xf32, #tpu.memory_space<vmem>>, %arg4: memref<1x1x128xf32, #tpu.memory_space<vmem>>, %arg5: memref<1x8x128xf32, #tpu.memory_space<vmem>>) attributes {dimension_semantics = [#tpu.dimension_semantics<parallel>, #tpu.dimension_semantics<parallel>], iteration_bounds = array<i64: 2, 1>, scalar_prefetch = 0 : i64, scratch_operands = 0 : i64, tpu.core_type = #tpu.core_type<tc>, window_params = [{transform_indices = @transform_0, window_bounds = array<i64: 1, 8, 128>}, {pipeline_mode = #tpu.pipeline_mode<synchronous>, transform_indices = @transform_1, window_bounds = array<i64: 1, 8, 128>}, {transform_indices = @transform_2, window_bounds = array<i64: 1, 1, 128>}, {transform_indices = @transform_3, window_bounds = array<i64: 1, 8, 128>}]} {
    %c0 = arith.constant 0 : index
    %c0_0 = arith.constant 0 : index
    %c0_1 = arith.constant 0 : index
    %0 = vector.load %arg2[%c0, %c0_0, %c0_1] : memref<1x8x128xf32, #tpu.memory_space<vmem>>, vector<1x8x128xf32>
    %c0_2 = arith.constant 0 : index
    %c0_3 = arith.constant 0 : index
    %c0_4 = arith.constant 0 : index
    %1 = vector.load %arg3[%c0_2, %c0_3, %c0_4] : memref<1x8x128xf32, #tpu.memory_space<vmem>>, vector<1x8x128xf32>
    %2 = arith.addf %0, %1 : vector<1x8x128xf32>
    %c0_5 = arith.constant 0 : index
    %c0_6 = arith.constant 0 : index
    %c0_7 = arith.constant 0 : index
    %3 = vector.load %arg4[%c0_5, %c0_6, %c0_7] : memref<1x1x128xf32, #tpu.memory_space<vmem>>, vector<1x1x128xf32>
    %4 = vector.broadcast %3 : vector<1x1x128xf32> to vector<1x8x128xf32>
    %5 = arith.addf %2, %4 : vector<1x8x128xf32>
    %c0_8 = arith.constant 0 : index
    %c0_9 = arith.constant 0 : index
    %c0_10 = arith.constant 0 : index
    %6 = vector.load %arg5[%c0_8, %c0_9, %c0_10] : memref<1x8x128xf32, #tpu.memory_space<vmem>>, vector<1x8x128xf32>
    tpu.vector_store %arg5[%c0_8, %c0_9, %c0_10], %5 {strides = array<i32>} : memref<1x8x128xf32, #tpu.memory_space<vmem>>, vector<1x8x128xf32>,
    return
  }
  func.func @transform_0(%arg0: i32, %arg1: i32) -> (i32, i32, i32) {
    %c0_i32 = arith.constant 0 : i32
    %c0_i32_0 = arith.constant 0 : i32
    return %arg0, %arg1, %c0_i32 : i32, i32, i32
  }
  func.func @transform_1(%arg0: i32, %arg1: i32) -> (i32, i32, i32) {
    %c0_i32 = arith.constant 0 : i32
    %c0_i32_0 = arith.constant 0 : i32
    %c0_i32_1 = arith.constant 0 : i32
    return %c0_i32, %arg1, %c0_i32_0 : i32, i32, i32
  }
  func.func @transform_2(%arg0: i32, %arg1: i32) -> (i32, i32, i32) {
    %c0_i32 = arith.constant 0 : i32
    %c0_i32_0 = arith.constant 0 : i32
    %c0_i32_1 = arith.constant 0 : i32
    return %arg0, %c0_i32, %c0_i32_0 : i32, i32, i32
  }
  func.func @transform_3(%arg0: i32, %arg1: i32) -> (i32, i32, i32) {
    %c0_i32 = arith.constant 0 : i32
    %c0_i32_0 = arith.constant 0 : i32
    return %arg0, %arg1, %c0_i32 : i32, i32, i32
  }
}

</mosaic_0001>

<bundles_post_ra>
// kernel: transreid_forward.1
= control target key start
LH: loop header
LB: loop body
LE: loop exit
PB: predicated region body
PF: predicated region fallthrough
CT: control target
= control target key end

     0   :  { %8 = vsyncpa [#allocation3], 0  ;;  %s616_s0 = inlined_call_operand.vmem [shape: f32[2,8,128], index: 0, kind: input, shape index: {}]   ;;  %s617_s1 = inlined_call_operand.vmem [shape: f32[1,8,128], index: 1, kind: input, shape index: {}]   ;;  %s618_s2 = inlined_call_operand.vmem [shape: f32[2,1,128], index: 2, kind: input, shape index: {}]   ;;  %s619_s3 = inlined_call_operand.hbm [shape: f32[2,8,128], index: 3, kind: output, shape index: {}]  }
   0x1   :  { %10 = vsyncpa [#allocation3 + $0x1], 0  ;;  %s511_s12 = smov 0   ;;  %s513_s13 = smov 0  }
   0x2   :  { %s515_s14 = smov 0   ;;  %s517_s15 = smov 0  }
   0x3   :  { %s519_s16 = smov 0   ;;  %s521_s17 = smov 0  }
   0x4 LB: > { %s344_s18 = sadd.s32 4294967295, %s488_s17   ;;  %s345_s19 = sadd.s32 4294967294, %s488_s17   ;;  %s488_s17 = sphi %s521_s17, %s16_s17   ;;  %s484_s16 = sphi %s519_s16, %s626_s16   ;;  %s480_s15 = sphi %s517_s15, %s625_s15   ;;  %s476_s14 = sphi %s515_s14, %s624_s14   ;;  %s472_s13 = sphi %s513_s13, %s623_s13   ;;  %s468_s12 = sphi %s511_s12, %s622_s12  }
   0x5   : > { %s28_s20 = sadd.s32 1, %s484_s16  ;;  %s117_s21 = sadd.s32 1, %s476_s14 }
   0x6   : > { %p30_p0 = scmp.ge.s32.totalorder %s28_s20, 2  ;;  %p127_p1 = scmp.ne.s32.totalorder %s476_s14, %s472_s13 }
   0x7   : > { %p128_p2 = scmp.eq.s32.totalorder %s344_s18, 1  ;;  %p133_p3 = scmp.ne.s32.totalorder %s472_s13, %s468_s12 }
   0x8   : > { %s628_s20 = smov (%p30_p0, %s28_s20), 0  ;;  %p134_p5 = scmp.eq.s32.totalorder %s345_s19, 1 }
   0x9   : > { %p551_p4 = por %p128_p2, %p127_p1  ;;  %s112_s23 = ssub.s32 %s484_s16, %s628_s20 }
   0xa   : > { %p349_p6 = scmp.ge.s32.totalorder %s488_s17, 1  ;;  %p115_p7 = scmp.eq.s32.totalorder %s112_s23, 0 }
   0xb   : > { %p558_p8 = por %p134_p5, %p133_p3  ;;  %p175_p9 = scmp.lt.s32.totalorder %s488_s17, 3 }
   0xc   : > { %s564_s25 = scalar_select %p115_p7, %s476_s14, %s117_s21  }
   0xd   : > { %p176_p10 = pnand %p349_p6, %p175_p9 }
   0xe   : > { %s205_s26 = sand.u32 (!%p176_p10), 1, %s472_s13   ;;  %p208_p11 = scmp.lt.s32.totalorder (!%p176_p10), %s480_s15, 1 }
   0xf   : > { %179 = sbr.rel (%p176_p10) target bundleno = 45 (0x2d), region = 32  ;;  %s350_s27 = sshll.u32 (!%p176_p10), %s205_s26, 3 }
  0x10   : > { %s207_s11 = scalar_lea.vmem (!%p176_p10), [#allocation2], %s350_s27  ;;  %s354_s19 = sshll.u32 (!%p176_p10), %s480_s15, 7 }
  0x11   : > { %s249_s18 = sshll.u32 (!%p176_p10), %s207_s11, 4  ;;  %s235_s30 = scalar_lea.sflag (!%p176_p10), [#allocation3], %s205_s26  ;;  %s250_s18 = int_to_ptr.vmem [resolvable:$true] %s249_s18 }
  0x12   : > { %s412_s4 = scalar_lea.vmem (!%p176_p10), %s250_s18, 128 }
  0x13   : > { %p413_p12 = scmp.ne.s32.totalorder (!%p176_p10), %s250_s18, %s412_s4 }
  0x14   : > { %s209_s28 = scalar_select %p208_p11, %s480_s15, 1  ;;  %v223_v0 = vld [vmem:[%s617_s1] sm:$0xff] }
  0x15   : > { %p414_p13 = pnand %p413_p12, %p551_p4 }
  0x16   : > { %s351_s29 = sshll.u32 %s209_s28, 3  ;;  %s221_s5 = scalar_lea.vmem %s618_s2, %s209_s28 }
  0x17   : > { %s214_s10 = scalar_lea.vmem %s616_s0, %s351_s29  ;;  %v352_v2 = vld [vmem:[%s221_s5] ss:$0 sm:$0xff]  ;;  %s247_s28 = scalar_lea.hbm %s619_s3, %s354_s19 }
  0x18   : > { %v222_v1 = vld [vmem:[%s214_s10] sm:$0xff]  ;;  %p415_p0 = pneg %p414_p13  ;;  %s490_s29 = smov [#allocation2]  }
  0x19   : > { %v224_v3 = vadd.f32 %v223_v0, %v222_v1  ;;  %s416_s6 = sshll.u32 %s490_s29, 4  ;;  %s417_s6 = int_to_ptr.vmem [resolvable:$false] %s416_s6 }
  0x1a   : > { %s418_s27 = scalar_lea.vmem %s417_s6, 256  ;;  %p419_p1 = scmp.lt.s32.totalorder %s250_s18, %s417_s6 }
  0x1b   : > { %v232_v4 = vadd.f32 %v352_v2, %v224_v3  ;;  %p420_p2 = scmp.lt.s32.totalorder %s418_s27, %s412_s4 }
  0x1d   : > { %233 = vst [vmem:[%s207_s11] sm:$0xff] %v232_v4  ;;  %p421_p3 = por %p420_p2, %p419_p1 }
  0x1f   : > { %p422_p5 = pnand %p421_p3, %p415_p0 }
  0x21   : > { %425 = shalt.err (!%p422_p5)
}
  0x22   : > { %s426_s15 = scalar_lea.hbm %s247_s28, 128  ;;  %s430_s7 = scalar_lea.hbm %s619_s3, 256 }
  0x23   : > { %p427_p6 = scmp.ne.s32.totalorder %s247_s28, %s426_s15  ;;  %p431_p10 = scmp.lt.s32.totalorder %s247_s28, %s619_s3 }
  0x24   : > { %p432_p11 = scmp.lt.s32.totalorder %s430_s7, %s426_s15 }
  0x25   : > { %p428_p7 = pnand %p427_p6, %p551_p4 }
  0x26   : > { %p433_p12 = por %p432_p11, %p431_p10 }
  0x27   : > { %p429_p9 = pneg %p428_p7 }
  0x29   : > { %p434_p13 = pnand %p433_p12, %p429_p9 }
  0x2b   : > { %437 = shalt.err (!%p434_p13)
}
  0x2c   : > { %357 = dma.vmem_to_hbm [thread:$0]  (%p551_p4), %s250_s18, 128, %s247_s28, %s235_s30  }
  0x2d PF: > { %p363_p0 = scmp.ge.s32.totalorder %s488_s17, 2  ;;  %s261_s10 = sand.u32 1, %s468_s12  }
  0x2e   : > { %s262_s11 = scalar_lea.sflag [#allocation3], %s261_s10 }
  0x2f   : > { %p360_p1 = pnand %p363_p0, %p558_p8 }
  0x31   : > { %p361_p2 = pneg %p360_p1 }
  0x33   : > { %463 = dma.done.wait (%p361_p2), %s262_s11, 128  }
  0x34   : > { %465 = vsyncadd (%p361_p2), %s262_s11, 4294967168  ;;  %s16_s17 = sadd.s32 1, %s488_s17   ;;  %s622_s12 = smov %s472_s13 }
  0x35   : > { %p13_p3 = scmp.ge.s32.totalorder %s16_s17, 4   ;;  %s623_s13 = smov %s476_s14 }
  0x36   : > { %s624_s14 = smov %s564_s25  ;;  %s625_s15 = smov %s484_s16 }
  0x37   : > { %s626_s16 = smov %s628_s20  ;;  %15 = sbr.rel (!%p13_p3) target bundleno = 4 (0x4), region = 73 }
  0x3c   :  { %267 = vsyncpa [#allocation3], 1 }
  0x3d   :  { %269 = vsyncpa [#allocation3 + $0x1], 1 }

</bundles_post_ra>
